<compile_context>
chip_gen: v5e
topology: v5e:2x2
jax: 0.10.0
libtpu: 0.0.40
codegen_flags: <defaults>
</compile_context>

<pallas_src>
import jax
import jax.numpy as jnp
from jax.experimental import pallas as pl
from jax.experimental.pallas import tpu as pltpu

LANE = 128  # TPU lane width: hidden/out feature dims are padded to this.


def gcn_kernel(a_ref, xr_ref, w1_ref, b1_ref, w2_ref, b2_ref, o_ref):
    """Fused two-layer GCN forward (single grid-less program).

    a_ref : (N, N)        f32   normalized adjacency  D^-1/2 (A+I) D^-1/2
    xr_ref: (1, N)        f32   node features (F_in = 1), stored as a row
    w1_ref: (1, LANE)     f32   conv1 weight, zero past col 16
    b1_ref: (1, LANE)     f32   conv1 bias,   zero-padded
    w2_ref: (LANE, LANE)  bf16  conv2 weight, zero past row 16 / col 32
    b2_ref: (1, LANE)     f32   conv2 bias,   zero-padded
    o_ref : (N, LANE)     f32   output, valid columns = first 32
    """
    a = a_ref[...]  # f32 (kept full precision for both aggregations)

    # ---- layer 1: GCNConv(1 -> 16) ----
    # F_in == 1  =>  A @ (x @ W1) == (A @ x) * W1 (associativity).  The (N, 1)
    # aggregation is a VPU broadcast-multiply + lane reduce at this size; for
    # large N switch this line to an MXU mat-vec / row-tiled matmul.
    ax = jnp.sum(a * xr_ref[...], axis=1, keepdims=True)             # (N, 1)
    h1 = jnp.maximum(ax * w1_ref[...] + b1_ref[...], 0.0)            # (N, LANE)

    # ---- layer 2: GCNConv(16 -> 32) ----
    # Feature transform on the MXU with bf16 operands / f32 accumulation; the
    # final aggregation keeps both operands in f32 (one fewer bf16 rounding,
    # free at 16x16x128).
    xw2 = jnp.dot(
        h1.astype(jnp.bfloat16), w2_ref[...],
        preferred_element_type=jnp.float32,
    )                                                                 # (N, LANE) f32
    o_ref[...] = (
        jnp.dot(a, xw2, preferred_element_type=jnp.float32) + b2_ref[...]
    ).astype(o_ref.dtype)


@jax.jit
def gcn_forward(a_hat, x, w1, b1, w2, b2):
    """GCN forward matching the PyTorch module.

    a_hat: (N, N) f32, x: (N, 1) f32,
    w1: (1, 16), b1: (16,), w2: (16, 32), b2: (32,)  ->  (N, 32) f32.
    """
    n = a_hat.shape[0]
    f_in = x.shape[1]
    hidden = w1.shape[1]
    out_dim = w2.shape[1]

    # Constant prep (lane-dense zero padding / casts / reshape).  Inside jit
    # this fuses with the pallas_call and the output slice into one dispatch.
    x_row = x.reshape(1, n).astype(jnp.float32)                       # (1, N)
    w1_p = jnp.zeros((f_in, LANE), jnp.float32).at[:, :hidden].set(w1)
    b1_p = jnp.zeros((1, LANE), jnp.float32).at[0, :hidden].set(b1)
    w2_p = (
        jnp.zeros((LANE, LANE), jnp.float32).at[:hidden, :out_dim].set(w2)
    ).astype(jnp.bfloat16)                                            # MXU operand
    b2_p = jnp.zeros((1, LANE), jnp.float32).at[0, :out_dim].set(b2)

    vmem = pl.BlockSpec(memory_space=pltpu.MemorySpace.VMEM)

    flops = (
        2 * n * n                 # layer-1 aggregation (mat-vec)
        + 3 * n * LANE            # layer-1 scale + bias + relu
        + 2 * n * LANE * LANE     # layer-2 feature transform (MXU)
        + 2 * n * n * LANE        # layer-2 aggregation (MXU)
    )
    bytes_accessed = (
        n * n * 4                 # a_hat
        + n * 4                   # x_row
        + LANE * 4 * 3            # w1_p, b1_p, b2_p
        + LANE * LANE * 2         # w2_p (bf16)
        + n * LANE * 4            # output
    )

    out_p = pl.pallas_call(
        gcn_kernel,
        out_shape=jax.ShapeDtypeStruct((n, LANE), jnp.float32),
        in_specs=[vmem] * 6,
        out_specs=vmem,
        cost_estimate=pl.CostEstimate(
            flops=flops, transcendentals=0, bytes_accessed=bytes_accessed
        ),
    )(a_hat.astype(jnp.float32), x_row, w1_p, b1_p, w2_p, b2_p)
    return out_p[:, :out_dim]


def build_normalized_adjacency(edge_index, num_nodes):
    """Dense D^{-1/2} (A + I) D^{-1/2} with unit edge weights (GCNConv default).

    Mirrors PyG's add_remaining_self_loops: a self-loop is only added for
    nodes that do not already have one.
    """
    src, dst = edge_index[0], edge_index[1]
    a = jnp.zeros((num_nodes, num_nodes), jnp.float32).at[dst, src].add(1.0)
    diag = jnp.diagonal(a)
    a = a + jnp.diag(jnp.where(diag > 0, 0.0, 1.0))
    deg = a.sum(axis=1)
    dinv_sqrt = jnp.where(deg > 0, jax.lax.rsqrt(deg), 0.0)
    return dinv_sqrt[:, None] * a * dinv_sqrt[None, :]


def glorot(key, shape):
    fan_in, fan_out = shape
    limit = jnp.sqrt(6.0 / (fan_in + fan_out))
    return jax.random.uniform(key, shape, jnp.float32, -limit, limit)


if __name__ == "__main__":
    key = jax.random.PRNGKey(0)
    N = 16  # number of graph nodes

    # deterministic small graph: bidirectional ring over 16 nodes -> (2, 32)
    src = jnp.arange(N, dtype=jnp.int32)
    dst = (src + 1) % N
    edge_index = jnp.concatenate(
        [jnp.stack([src, dst]), jnp.stack([dst, src])], axis=1
    )

    k_x, k_w1, k_w2 = jax.random.split(key, 3)
    # node_features: one scalar feature per node (GCNConv(1, 16) input)
    x = jax.random.normal(k_x, (N, 1), dtype=jnp.float32)

    # GCNConv params: glorot weights, zero biases (PyG defaults), deterministic.
    w1 = glorot(k_w1, (1, 16))
    b1 = jnp.zeros((16,), jnp.float32)
    w2 = glorot(k_w2, (16, 32))
    b2 = jnp.zeros((32,), jnp.float32)

    a_hat = build_normalized_adjacency(edge_index, N)

    out = jax.block_until_ready(gcn_forward(a_hat, x, w1, b1, w2, b2))

    # pure-JAX f32 reference of the same forward pass
    h1_ref = jnp.maximum(a_hat @ (x @ w1) + b1[None, :], 0.0)
    ref = a_hat @ (h1_ref @ w2) + b2[None, :]
    assert out.shape == (N, 32)
    # only the h1 @ W2 matmul uses bf16 operands -> modest tolerance vs f32 ref
    assert jnp.allclose(out, ref, atol=2e-2, rtol=2e-2), float(
        jnp.max(jnp.abs(out - ref))
    )

    print("KERNEL_OK")
</pallas_src>

<mosaic_0001>
module attributes {stable_mosaic.version = 11 : i64} {
  func.func @gcn_kernel(%arg0: memref<16x16xf32, #tpu.memory_space<vmem>>, %arg1: memref<1x16xf32, #tpu.memory_space<vmem>>, %arg2: memref<1x128xf32, #tpu.memory_space<vmem>>, %arg3: memref<1x128xf32, #tpu.memory_space<vmem>>, %arg4: memref<128x128xbf16, #tpu.memory_space<vmem>>, %arg5: memref<1x128xf32, #tpu.memory_space<vmem>>, %arg6: memref<16x128xf32, #tpu.memory_space<vmem>>) attributes {dimension_semantics = [], scalar_prefetch = 0 : i64, scratch_operands = 0 : i64, tpu.core_type = #tpu.core_type<tc>} {
    %c0 = arith.constant 0 : index
    %c0_0 = arith.constant 0 : index
    %0 = vector.load %arg0[%c0, %c0_0] : memref<16x16xf32, #tpu.memory_space<vmem>>, vector<16x16xf32>
    %c0_1 = arith.constant 0 : index
    %c0_2 = arith.constant 0 : index
    %1 = vector.load %arg1[%c0_1, %c0_2] : memref<1x16xf32, #tpu.memory_space<vmem>>, vector<1x16xf32>
    %2 = vector.broadcast %1 : vector<1x16xf32> to vector<16x16xf32>
    %3 = arith.mulf %0, %2 : vector<16x16xf32>
    %cst = arith.constant dense<0.000000e+00> : vector<16xf32>
    %4 = vector.multi_reduction <add>, %3, %cst [1] : vector<16x16xf32> to vector<16xf32>
    %5 = vector.shape_cast %4 : vector<16xf32> to vector<16x1xf32>
    %c0_3 = arith.constant 0 : index
    %c0_4 = arith.constant 0 : index
    %6 = vector.load %arg2[%c0_3, %c0_4] : memref<1x128xf32, #tpu.memory_space<vmem>>, vector<1x128xf32>
    %7 = vector.broadcast %5 : vector<16x1xf32> to vector<16x128xf32>
    %8 = vector.broadcast %6 : vector<1x128xf32> to vector<16x128xf32>
    %9 = arith.mulf %7, %8 : vector<16x128xf32>
    %c0_5 = arith.constant 0 : index
    %c0_6 = arith.constant 0 : index
    %10 = vector.load %arg3[%c0_5, %c0_6] : memref<1x128xf32, #tpu.memory_space<vmem>>, vector<1x128xf32>
    %11 = vector.broadcast %10 : vector<1x128xf32> to vector<16x128xf32>
    %12 = arith.addf %9, %11 : vector<16x128xf32>
    %cst_7 = arith.constant 0.000000e+00 : f32
    %13 = vector.broadcast %cst_7 : f32 to vector<16x128xf32>
    %14 = arith.maximumf %12, %13 : vector<16x128xf32>
    %15 = arith.truncf %14 : vector<16x128xf32> to vector<16x128xbf16>
    %c0_8 = arith.constant 0 : index
    %c0_9 = arith.constant 0 : index
    %16 = vector.load %arg4[%c0_8, %c0_9] : memref<128x128xbf16, #tpu.memory_space<vmem>>, vector<128x128xbf16>
    %cst_10 = arith.constant dense<0.000000e+00> : vector<16x128xf32>
    %17 = tpu.matmul %15, %16, %cst_10 {dimension_numbers = #tpu.dot_dimension_numbers<[1], [0], [0], [1], [0, 0, 1, 1], [], []>} : vector<16x128xbf16>, vector<128x128xbf16>, vector<16x128xf32> -> vector<16x128xf32>
    %cst_11 = arith.constant dense<0.000000e+00> : vector<16x128xf32>
    %18 = tpu.matmul %0, %17, %cst_11 {dimension_numbers = #tpu.dot_dimension_numbers<[1], [0], [0], [1], [0, 0, 1, 1], [], []>} : vector<16x16xf32>, vector<16x128xf32>, vector<16x128xf32> -> vector<16x128xf32>
    %c0_12 = arith.constant 0 : index
    %c0_13 = arith.constant 0 : index
    %19 = vector.load %arg5[%c0_12, %c0_13] : memref<1x128xf32, #tpu.memory_space<vmem>>, vector<1x128xf32>
    %20 = vector.broadcast %19 : vector<1x128xf32> to vector<16x128xf32>
    %21 = arith.addf %18, %20 : vector<16x128xf32>
    %c0_14 = arith.constant 0 : index
    %c0_15 = arith.constant 0 : index
    %22 = vector.load %arg6[%c0_14, %c0_15] : memref<16x128xf32, #tpu.memory_space<vmem>>, vector<16x128xf32>
    tpu.vector_store %arg6[%c0_14, %c0_15], %21 {strides = array<i32>} : memref<16x128xf32, #tpu.memory_space<vmem>>, vector<16x128xf32>,
    return
  }
}

</mosaic_0001>

<bundles_post_ra>
// kernel: gcn_forward.1
= control target key start
LH: loop header
LB: loop body
LE: loop exit
PB: predicated region body
PF: predicated region fallthrough
CT: control target
= control target key end

     0   :  { %vm32_vm0 = vcmask 130048   ;;  %s347_s0 = inlined_call_operand.vmem [shape: f32[16,16], index: 0, kind: input, shape index: {}]   ;;  %s348_s1 = inlined_call_operand.vmem [shape: f32[1,16], index: 1, kind: input, shape index: {}]   ;;  %s349_s2 = inlined_call_operand.vmem [shape: f32[1,128], index: 2, kind: input, shape index: {}]   ;;  %s350_s3 = inlined_call_operand.vmem [shape: f32[1,128], index: 3, kind: input, shape index: {}]   ;;  %s351_s4 = inlined_call_operand.vmem [shape: bf16[128,128], index: 4, kind: input, shape index: {}]   ;;  %s352_s5 = inlined_call_operand.vmem [shape: f32[1,128], index: 5, kind: input, shape index: {}]   ;;  %s353_s6 = inlined_call_operand.hbm [shape: f32[16,128], index: 6, kind: output, shape index: {}]  }
   0x1   :  { %v24_v0 = vld [vmem:[%s347_s0] sm:$0xff]  ;;  %v226_v2 = vld [vmem:[%s351_s4 + $0x38] sm:$0xff]  ;;  %v25_v4 = vld [vmem:[%s347_s0 + $0x8] sm:$0xff] }
   0x2   :  { %v230_v1 = vld [vmem:[%s348_s1] ss:$0 sm:$0xff]  ;;  %118 = vmatpush.bf16.msra.mxu0 %v226_v2  ;;  %v225_v5 = vld [vmem:[%s351_s4 + $0x30] sm:$0xff] }
   0x3   :  { %v30_v3 = vmul.f32 %v230_v1, %v24_v0 }
   0x5   :  { %v33_v6 = vsel %vm32_vm0, %v30_v3, 0.0 }
   0x6   :  { %11 = vsyncpa [#allocation3], 0  ;;  %34 = vadd.xlane.f32.xlu0 %v33_v6  ;;  %v31_v7 = vmul.f32 %v230_v1, %v25_v4  ;;  %119 = vmatpush.bf16.msra.mxu0 %v225_v5  ;;  %v224_v8 = vld [vmem:[%s351_s4 + $0x28] sm:$0xff]  ;;  %v223_v10 = vld [vmem:[%s351_s4 + $0x20] sm:$0xff]  ;;  %s173_s24 = sshll.u32 %s353_s6, 4  ;;  %s261_s25 = smov 128   ;;  %s174_s24 = int_to_ptr.hbm [resolvable:$true] %s173_s24 }
   0x7   :  { %v222_v11 = vld [vmem:[%s351_s4 + $0x18] sm:$0xff]  ;;  %v221_v12 = vld [vmem:[%s351_s4 + $0x10] sm:$0xff]  ;;  %v220_v13 = vld [vmem:[%s351_s4 + $0x8] sm:$0xff]  ;;  %s262_s26 = smov 8  }
   0x8   :  { %v36_v9 = vsel %vm32_vm0, %v31_v7, 0.0  ;;  %v219_v14 = vld [vmem:[%s351_s4] sm:$0xff] }
   0x9   :  { %v231_v16 = vld [vmem:[%s349_s2] ss:$0 sm:$0xff] }
   0xa   :  { %120 = vmatpush.bf16.msra.mxu0 %v224_v8  ;;  %v232_v17 = vld [vmem:[%s350_s3] ss:$0 sm:$0xff]  ;;  %s260_s3 = smov [#allocation2]  }
   0xb   :  { %v233_v28 = vld [vmem:[%s352_s5] ss:$0 sm:$0xff]  ;;  %s171_s21 = sshll.u32 %s260_s3, 4  ;;  %s172_s21 = int_to_ptr.vmem [resolvable:$true] %s171_s21 }
   0xe   :  { %37 = vadd.xlane.f32.xlu0 %v36_v9  ;;  %121 = vmatpush.bf16.msra.mxu0 %v223_v10 }
  0x12   :  { %122 = vmatpush.bf16.msra.mxu0 %v222_v11 }
  0x16   :  { %123 = vmatpush.bf16.msra.mxu0 %v221_v12 }
  0x1a   :  { %124 = vmatpush.bf16.msra.mxu0 %v220_v13 }
  0x1e   :  { %125 = vmatpush.bf16.msra.mxu0 %v219_v14 }
  0x79   :  { %v35_v15 = vpop.xlane.xlu0 %34 }
  0x7a   :  { %v43_v18 = vmul.f32 %v231_v16, %v35_v15 }
  0x7c   :  { %v49_v20 = vadd.f32 %v232_v17, %v43_v18 }
  0x7e   :  { %v51_v23 = vmax.f32 %v49_v20, 0.0 }
  0x81   :  { %v38_v19 = vpop.xlane.xlu0 %37 }
  0x82   :  { %v44_v21 = vmul.f32 %v231_v16, %v38_v19 }
  0x84   :  { %v50_v22 = vadd.f32 %v232_v17, %v44_v21 }
  0x86   :  { %v52_v24 = vmax.f32 %v50_v22, 0.0 }
  0x88   :  { %v53_v25 = vpack.c.bf16 %v52_v24, %v51_v23 }
  0x8a   :  { %126 = vmatmul.bf16.vlgmr.msra.gmra.mxu0 %v53_v25 }
 0x107   :  { %v127_v26 = vpop.f32.mrf.mxu0 }
 0x10f   :  { %v129_v27 = vpop.f32.mrf.mxu0 }
 0x110   :  { %156 = vmatpush.msra.mxu1 %v129_v27 }
 0x112   :  { %157 = vmatpush.msra.mxu1 %v127_v26 }
 0x113   :  { %217 = vmatmul.msk.f32.vlgmr.msra.gmra.mxu1 %vm32_vm0, %v24_v0 }
 0x11b   :  { %218 = vmatmul.msk.f32.gmra.mxu1 %vm32_vm0, %v25_v4 }
 0x190   :  { %v159_v29 = vpop.f32.mrf.mxu1 }
 0x191   :  { %v160_v30 = vadd.f32 %v233_v28, %v159_v29 }
 0x193   :  { %165 = vst [vmem:[#allocation2] sm:$0xff] %v160_v30 }
 0x198   :  { %v162_v31 = vpop.f32.mrf.mxu1 }
 0x199   :  { %v163_v32 = vadd.f32 %v233_v28, %v162_v31 }
 0x19b   :  { %166 = vst [vmem:[#allocation2 + $0x8] sm:$0xff] %v163_v32 }
 0x19c   :  { %179 = dma.vmem_to_hbm [thread:$0]  %s172_s21, 256, %s174_s24, [#allocation3], %s261_s25, %s261_s25, %s262_s26  }
 0x19d   :  { %258 = dma.done.wait [#allocation3], 256  }
 0x19e   :  { %259 = vsyncadd [#allocation3], 4294967040 }
 0x19f   :  { %184 = vsyncpa [#allocation3], 1 }

</bundles_post_ra>
